<compile_context>
chip_gen: v7x
topology: tpu7x:2x2x1
jax: 0.10.0
libtpu: 0.0.40
codegen_flags: <defaults>
</compile_context>

<pallas_src>
import functools

import jax
import jax.numpy as jnp
from jax.experimental import pallas as pl
from jax.experimental.pallas import tpu as pltpu


def _round_up(n, m):
    return ((n + m - 1) // m) * m


def _make_const_spec(shape):
    """BlockSpec for a grid-invariant (VMEM-resident) operand.

    Uses pipeline_mode=pl.Buffered(1) when available so the operand is
    single-buffered (constant index map -> no double buffer needed).
    """
    index_map = lambda i: (0, 0)
    if hasattr(pl, "Buffered"):
        try:
            return pl.BlockSpec(shape, index_map, pipeline_mode=pl.Buffered(1))
        except TypeError:  # older BlockSpec signature without pipeline_mode
            pass
    return pl.BlockSpec(shape, index_map)


# -----------------------------------------------------------------------------
# Kernel
# -----------------------------------------------------------------------------
def _gated_attn_kernel(x_ref, w_ab_ref, b_ab_ref, wc_ref, bc_ref, out_ref, *,
                       d_pad):
    x = x_ref[...]                                             # (Nb, L)
    # Fused gate projections: one (Nb, L) @ (L, 2*Dp) MXU matmul, f32 accumulate.
    h = jnp.dot(x, w_ab_ref[...], preferred_element_type=jnp.float32)
    h = h + b_ab_ref[...].astype(jnp.float32)                  # (Nb, 2*Dp)
    a = jnp.tanh(h[:, :d_pad])                                 # lane-aligned slice
    g = jax.nn.sigmoid(h[:, d_pad:])
    gated = a * g                                              # (Nb, Dp), f32

    if wc_ref.shape[0] == 1:
        # n_tasks == 1: VPU multiply + XLU lane reduce (skip the MXU).
        wc_row = wc_ref[...].astype(jnp.float32)               # (1, Dp)
        A = jnp.sum(gated * wc_row, axis=-1, keepdims=True)    # (Nb, 1)
    else:
        # n_tasks > 1: lane-dense (Nb, Dp) @ (Dp, T) MXU matmul, f32 throughout.
        A = jnp.dot(gated, wc_ref[...].astype(jnp.float32),
                    preferred_element_type=jnp.float32)        # (Nb, T)
    A = A + bc_ref[...].astype(jnp.float32)
    out_ref[...] = A.astype(out_ref.dtype)


# -----------------------------------------------------------------------------
# Parameter fusion (call ONCE per model, not per forward call)
# -----------------------------------------------------------------------------
def fuse_params(wa, ba, wb, bb, wc, bc, *, cast_to_bf16=True):
    """Fuse / pad Attn_Net_Gated parameters for the Pallas kernel.

    Args:
      wa, wb: (L, D) gate weights (transposed vs. PyTorch Linear.weight).
      ba, bb: (D,) or (1, D) gate biases.
      wc:     (D, T) output-projection weight.
      bc:     (T,) or (1, T) output-projection bias.
      cast_to_bf16: store the fused gate weight in bf16 (f32 accumulation).

    Returns a dict {w_ab, b_ab, wc, bc} of fused parameters.
    """
    L, D = wa.shape
    T = wc.shape[1]
    d_pad = _round_up(D, 128)        # lane-aligned split point in the kernel
    pad = d_pad - D

    wa_p = jnp.pad(wa, ((0, 0), (0, pad)))
    wb_p = jnp.pad(wb, ((0, 0), (0, pad)))
    ba_p = jnp.pad(jnp.reshape(ba, (1, D)).astype(jnp.float32), ((0, 0), (0, pad)))
    bb_p = jnp.pad(jnp.reshape(bb, (1, D)).astype(jnp.float32), ((0, 0), (0, pad)))
    wc_p = jnp.pad(wc.astype(jnp.float32), ((0, pad), (0, 0)))  # (Dp, T)

    w_ab = jnp.concatenate([wa_p, wb_p], axis=1)               # (L, 2*Dp)
    b_ab = jnp.concatenate([ba_p, bb_p], axis=1)               # (1, 2*Dp), f32
    if cast_to_bf16:
        w_ab = w_ab.astype(jnp.bfloat16)

    if T == 1:
        wc_f = jnp.transpose(wc_p)                              # (1, Dp) lane-dense row
    else:
        wc_f = wc_p                                             # (Dp, T)
    bc_f = jnp.reshape(bc, (1, T)).astype(jnp.float32)
    return dict(w_ab=w_ab, b_ab=b_ab, wc=wc_f, bc=bc_f)


# -----------------------------------------------------------------------------
# Forward wrapper
# -----------------------------------------------------------------------------
@functools.partial(jax.jit, static_argnames=("block_n", "cast_to_bf16"))
def attn_net_gated(x, w_ab, b_ab, wc, bc, *, block_n=1024, cast_to_bf16=True):
    """Pallas forward of Attn_Net_Gated; returns (A, x).

    x: (N, L).  w_ab/b_ab/wc/bc come from fuse_params().
    """
    N, L = x.shape
    two_dp = w_ab.shape[1]
    d_pad = two_dp // 2
    T = 1 if wc.shape[0] == 1 else wc.shape[1]

    x_in = x.astype(jnp.bfloat16) if cast_to_bf16 else x
    x_bytes = x_in.dtype.itemsize
    w_bytes = w_ab.dtype.itemsize

    # Row tile: large blocks amortize per-step overhead; cap by a VMEM budget
    # that is safe on every generation (notably v7x's 64 MiB per TC).  No
    # padding of x — grid is cdiv(N, block); OOB rows in the ragged last tile
    # are row-independent (may be garbage/NaN) and are masked on store.
    block = _round_up(min(block_n, N), 16)

    def vmem_est(blk):
        return (2 * blk * L * x_bytes                    # x double-buffer
                + 2 * blk * max(T, 8) * 4                # output double-buffer
                + 3 * blk * two_dp * 4                   # f32 temporaries (h, a*g, gated)
                + (L * two_dp + d_pad * max(T, 1)) * w_bytes  # resident weights
                + (two_dp + T) * 4 * 2)                  # biases

    budget = 40 * (1 << 20)
    while block > 16 and vmem_est(block) > budget:
        block = _round_up(block // 2, 16)

    grid = (pl.cdiv(N, block),)
    vmem_limit = int(min(max(32 << 20, vmem_est(block) * 3 // 2), 64 << 20))

    kernel = functools.partial(_gated_attn_kernel, d_pad=d_pad)

    A = pl.pallas_call(
        kernel,
        out_shape=jax.ShapeDtypeStruct((N, T), x.dtype),
        grid_spec=pltpu.PrefetchScalarGridSpec(
            num_scalar_prefetch=0,
            grid=grid,
            in_specs=[
                pl.BlockSpec((block, L), lambda i: (i, 0)),   # x tile (streamed)
                _make_const_spec((L, two_dp)),                # fused [Wa | Wb] (resident)
                _make_const_spec((1, two_dp)),                # fused [ba | bb]
                _make_const_spec(wc.shape),                   # Wc ((1,Dp) or (Dp,T))
                _make_const_spec((1, T)),                     # bc
            ],
            out_specs=pl.BlockSpec((block, T), lambda i: (i, 0)),
        ),
        compiler_params=pltpu.CompilerParams(
            dimension_semantics=("parallel",),
            vmem_limit_bytes=vmem_limit),
    )(x_in, w_ab, b_ab, wc, bc)

    # Module also returns the (untouched) input x.
    return A, x


# -----------------------------------------------------------------------------
# Reference + self-test
# -----------------------------------------------------------------------------
def _reference(x, wa, ba, wb, bb, wc, bc):
    a = jnp.tanh(x @ wa + jnp.reshape(ba, (1, -1)))
    b = jax.nn.sigmoid(x @ wb + jnp.reshape(bb, (1, -1)))
    return (a * b) @ wc + jnp.reshape(bc, (1, -1))


if __name__ == "__main__":
    key = jax.random.PRNGKey(0)

    # --- Case 1: n_tasks == 1 (module default head); N not a multiple of the
    #     tile size to exercise the ragged (pad-free) last tile.
    N, L, D, T = 300, 256, 128, 1
    kx, kwa, kba, kwb, kbb, kwc, kbc, k2 = jax.random.split(key, 8)
    x = jax.random.normal(kx, (N, L), dtype=jnp.float32)
    wa = jax.random.normal(kwa, (L, D), dtype=jnp.float32) * 0.05
    ba = jax.random.normal(kba, (D,), dtype=jnp.float32) * 0.05
    wb = jax.random.normal(kwb, (L, D), dtype=jnp.float32) * 0.05
    bb = jax.random.normal(kbb, (D,), dtype=jnp.float32) * 0.05
    wc = jax.random.normal(kwc, (D, T), dtype=jnp.float32) * 0.05
    bc = jax.random.normal(kbc, (T,), dtype=jnp.float32) * 0.05

    A_ref = _reference(x, wa, ba, wb, bb, wc, bc)

    # Default fast path: bf16 storage of x / gate weights, f32 accumulation.
    p16 = fuse_params(wa, ba, wb, bb, wc, bc, cast_to_bf16=True)
    A16, x_out = attn_net_gated(x, p16["w_ab"], p16["b_ab"], p16["wc"], p16["bc"],
                                cast_to_bf16=True)
    jax.block_until_ready((A16, x_out))
    assert A16.shape == (N, T) and x_out.shape == (N, L)
    assert jnp.array_equal(x_out, x)
    assert jnp.allclose(A16, A_ref, atol=5e-2, rtol=5e-2)

    # f32 storage path: tight tolerance.
    p32 = fuse_params(wa, ba, wb, bb, wc, bc, cast_to_bf16=False)
    A32, _ = attn_net_gated(x, p32["w_ab"], p32["b_ab"], p32["wc"], p32["bc"],
                            cast_to_bf16=False)
    jax.block_until_ready(A32)
    assert jnp.allclose(A32, A_ref, atol=1e-4, rtol=1e-4)

    # --- Case 2: n_tasks > 1 and D not a multiple of 128 (exercises the
    #     lane-alignment padding and the MXU output-projection branch).
    N2, L2, D2, T2 = 200, 128, 96, 3
    ks = jax.random.split(k2, 7)
    x2 = jax.random.normal(ks[0], (N2, L2), dtype=jnp.float32)
    wa2 = jax.random.normal(ks[1], (L2, D2), dtype=jnp.float32) * 0.05
    ba2 = jax.random.normal(ks[2], (D2,), dtype=jnp.float32) * 0.05
    wb2 = jax.random.normal(ks[3], (L2, D2), dtype=jnp.float32) * 0.05
    bb2 = jax.random.normal(ks[4], (D2,), dtype=jnp.float32) * 0.05
    wc2 = jax.random.normal(ks[5], (D2, T2), dtype=jnp.float32) * 0.05
    bc2 = jax.random.normal(ks[6], (T2,), dtype=jnp.float32) * 0.05

    A2_ref = _reference(x2, wa2, ba2, wb2, bb2, wc2, bc2)
    p2 = fuse_params(wa2, ba2, wb2, bb2, wc2, bc2, cast_to_bf16=False)
    A2, _ = attn_net_gated(x2, p2["w_ab"], p2["b_ab"], p2["wc"], p2["bc"],
                           cast_to_bf16=False)
    jax.block_until_ready(A2)
    assert A2.shape == (N2, T2)
    assert jnp.allclose(A2, A2_ref, atol=1e-4, rtol=1e-4)

    print("KERNEL_OK")
</pallas_src>

<mosaic_0001>
module attributes {stable_mosaic.version = 11 : i64} {
  func.func @_gated_attn_kernel(%arg0: i32, %arg1: memref<304x256xbf16, #tpu.memory_space<vmem>>, %arg2: memref<256x256xbf16, #tpu.memory_space<vmem>>, %arg3: memref<1x256xf32, #tpu.memory_space<vmem>>, %arg4: memref<1x128xf32, #tpu.memory_space<vmem>>, %arg5: memref<1x1xf32, #tpu.memory_space<vmem>>, %arg6: memref<304x1xf32, #tpu.memory_space<vmem>>) attributes {dimension_semantics = [#tpu.dimension_semantics<parallel>], iteration_bounds = array<i64: 1>, scalar_prefetch = 0 : i64, scratch_operands = 0 : i64, tpu.core_type = #tpu.core_type<tc>, window_params = [{transform_indices = @transform_0, window_bounds = array<i64: 304, 256>}, {pipeline_mode = #tpu.pipeline_mode<synchronous>, transform_indices = @transform_1, window_bounds = array<i64: 256, 256>}, {pipeline_mode = #tpu.pipeline_mode<synchronous>, transform_indices = @transform_2, window_bounds = array<i64: 1, 256>}, {pipeline_mode = #tpu.pipeline_mode<synchronous>, transform_indices = @transform_3, window_bounds = array<i64: 1, 128>}, {pipeline_mode = #tpu.pipeline_mode<synchronous>, transform_indices = @transform_4, window_bounds = array<i64: 1, 1>}, {transform_indices = @transform_5, window_bounds = array<i64: 304, 1>}]} {
    %c0 = arith.constant 0 : index
    %c0_0 = arith.constant 0 : index
    %0 = vector.load %arg1[%c0, %c0_0] : memref<304x256xbf16, #tpu.memory_space<vmem>>, vector<304x256xbf16>
    %c0_1 = arith.constant 0 : index
    %c0_2 = arith.constant 0 : index
    %1 = vector.load %arg2[%c0_1, %c0_2] : memref<256x256xbf16, #tpu.memory_space<vmem>>, vector<256x256xbf16>
    %cst = arith.constant dense<0.000000e+00> : vector<304x256xf32>
    %2 = tpu.matmul %0, %1, %cst {dimension_numbers = #tpu.dot_dimension_numbers<[1], [0], [0], [1], [0, 0, 1, 1], [], []>} : vector<304x256xbf16>, vector<256x256xbf16>, vector<304x256xf32> -> vector<304x256xf32>
    %c0_3 = arith.constant 0 : index
    %c0_4 = arith.constant 0 : index
    %3 = vector.load %arg3[%c0_3, %c0_4] : memref<1x256xf32, #tpu.memory_space<vmem>>, vector<1x256xf32>
    %4 = vector.broadcast %3 : vector<1x256xf32> to vector<304x256xf32>
    %5 = arith.addf %2, %4 : vector<304x256xf32>
    %6 = vector.extract_strided_slice %5 {offsets = [0, 0], sizes = [304, 128], strides = [1, 1]} : vector<304x256xf32> to vector<304x128xf32>
    %7 = math.tanh %6 : vector<304x128xf32>
    %8 = vector.extract_strided_slice %5 {offsets = [0, 128], sizes = [304, 128], strides = [1, 1]} : vector<304x256xf32> to vector<304x128xf32>
    %9 = arith.negf %8 : vector<304x128xf32>
    %10 = math.exp %9 : vector<304x128xf32>
    %cst_5 = arith.constant 1.000000e+00 : f32
    %11 = vector.broadcast %cst_5 : f32 to vector<304x128xf32>
    %12 = arith.addf %11, %10 : vector<304x128xf32>
    %13 = arith.divf %11, %12 : vector<304x128xf32>
    %14 = arith.mulf %7, %13 : vector<304x128xf32>
    %c0_6 = arith.constant 0 : index
    %c0_7 = arith.constant 0 : index
    %15 = vector.load %arg4[%c0_6, %c0_7] : memref<1x128xf32, #tpu.memory_space<vmem>>, vector<1x128xf32>
    %16 = vector.broadcast %15 : vector<1x128xf32> to vector<304x128xf32>
    %17 = arith.mulf %14, %16 : vector<304x128xf32>
    %cst_8 = arith.constant dense<0.000000e+00> : vector<304xf32>
    %18 = vector.multi_reduction <add>, %17, %cst_8 [1] : vector<304x128xf32> to vector<304xf32>
    %19 = vector.shape_cast %18 : vector<304xf32> to vector<304x1xf32>
    %c0_9 = arith.constant 0 : index
    %c0_10 = arith.constant 0 : index
    %20 = vector.load %arg5[%c0_9, %c0_10] : memref<1x1xf32, #tpu.memory_space<vmem>>, vector<1x1xf32>
    %21 = vector.broadcast %20 : vector<1x1xf32> to vector<304x1xf32>
    %22 = arith.addf %19, %21 : vector<304x1xf32>
    %c0_11 = arith.constant 0 : index
    %c0_12 = arith.constant 0 : index
    %23 = vector.load %arg6[%c0_11, %c0_12] : memref<304x1xf32, #tpu.memory_space<vmem>>, vector<304x1xf32>
    tpu.vector_store %arg6[%c0_11, %c0_12], %22 {strides = array<i32>} : memref<304x1xf32, #tpu.memory_space<vmem>>, vector<304x1xf32>,
    return
  }
  func.func @transform_0(%arg0: i32) -> (i32, i32) {
    %c0_i32 = arith.constant 0 : i32
    %c0_i32_0 = arith.constant 0 : i32
    return %arg0, %c0_i32 : i32, i32
  }
  func.func @transform_1(%arg0: i32) -> (i32, i32) {
    %c0_i32 = arith.constant 0 : i32
    %c0_i32_0 = arith.constant 0 : i32
    %c0_i32_1 = arith.constant 0 : i32
    return %c0_i32, %c0_i32_0 : i32, i32
  }
  func.func @transform_2(%arg0: i32) -> (i32, i32) {
    %c0_i32 = arith.constant 0 : i32
    %c0_i32_0 = arith.constant 0 : i32
    %c0_i32_1 = arith.constant 0 : i32
    return %c0_i32, %c0_i32_0 : i32, i32
  }
  func.func @transform_3(%arg0: i32) -> (i32, i32) {
    %c0_i32 = arith.constant 0 : i32
    %c0_i32_0 = arith.constant 0 : i32
    %c0_i32_1 = arith.constant 0 : i32
    return %c0_i32, %c0_i32_0 : i32, i32
  }
  func.func @transform_4(%arg0: i32) -> (i32, i32) {
    %c0_i32 = arith.constant 0 : i32
    %c0_i32_0 = arith.constant 0 : i32
    %c0_i32_1 = arith.constant 0 : i32
    return %c0_i32, %c0_i32_0 : i32, i32
  }
  func.func @transform_5(%arg0: i32) -> (i32, i32) {
    %c0_i32 = arith.constant 0 : i32
    %c0_i32_0 = arith.constant 0 : i32
    return %arg0, %c0_i32 : i32, i32
  }
}

</mosaic_0001>

<bundles_post_ra>
// kernel: attn_net_gated.1
= control target key start
LH: loop header
LB: loop body
LE: loop exit
PB: predicated region body
PF: predicated region fallthrough
CT: control target
= control target key end

     0   :  { %vm1147_vm0 = vcmask 7168   ;;  %s2382_s1 = inlined_call_operand.vmem [shape: bf16[256,256], index: 1, kind: input, shape index: {}]   ;;  %s2383_s0 = inlined_call_operand.vmem [shape: bf16[300,256], index: 0, kind: input, shape index: {}]   ;;  %s2384_s2 = inlined_call_operand.vmem [shape: f32[1,256], index: 2, kind: input, shape index: {}]   ;;  %s2385_s4 = inlined_call_operand.<no memory space> [shape: f32[1,1], index: 4, kind: input, shape index: {}]   ;;  %s2386_s3 = inlined_call_operand.vmem [shape: f32[1,128], index: 3, kind: input, shape index: {}]   ;;  %s2387_s5 = inlined_call_operand.vmem [shape: f32[300,1], index: 5, kind: output, shape index: {}]  }
   0x1   :  { %v1332_v0 = vld [vmem:[%s2382_s1 + $0x4] ss:$8 sps:$4 sm:$0xff]   ;;  %v1334_v1 = vld [vmem:[%s2382_s1] ss:$8 sps:$4 sm:$0xff]   ;;  %v1335_v2 = vld [vmem:[%s2382_s1 + $0x14] ss:$8 sps:$4 sm:$0xff]  }
   0x2   :  { %454 = vmatprep.subr.bf16.mxu0 %v1332_v0  ;;  %1300 = vmatprep.subr.bf16.mxu1 %v1332_v0  ;;  %v1337_v3 = vld [vmem:[%s2382_s1 + $0x10] ss:$8 sps:$4 sm:$0xff]   ;;  %v1338_v4 = vld [vmem:[%s2382_s1 + $0x24] ss:$8 sps:$4 sm:$0xff]   ;;  %v1340_v5 = vld [vmem:[%s2382_s1 + $0x20] ss:$8 sps:$4 sm:$0xff]  }
   0x3   :  { %455 = vmatpush1.bf16.msra.mxu0 %v1334_v1  ;;  %1316 = vmatpush1.bf16.msra.mxu1 %v1334_v1  ;;  %v1341_v6 = vld [vmem:[%s2382_s1 + $0x34] ss:$8 sps:$4 sm:$0xff]   ;;  %v1343_v7 = vld [vmem:[%s2382_s1 + $0x30] ss:$8 sps:$4 sm:$0xff]   ;;  %v1344_v8 = vld [vmem:[%s2382_s1 + $0x44] ss:$8 sps:$4 sm:$0xff]  }
   0x4   :  { %456 = vmatprep.subr.bf16.mxu0 %v1335_v2  ;;  %1301 = vmatprep.subr.bf16.mxu1 %v1335_v2  ;;  %v1346_v9 = vld [vmem:[%s2382_s1 + $0x40] ss:$8 sps:$4 sm:$0xff]   ;;  %v1347_v10 = vld [vmem:[%s2382_s1 + $0x54] ss:$8 sps:$4 sm:$0xff]   ;;  %v1349_v11 = vld [vmem:[%s2382_s1 + $0x50] ss:$8 sps:$4 sm:$0xff]  }
   0x5   :  { %v1350_v12 = vld [vmem:[%s2382_s1 + $0x64] ss:$8 sps:$4 sm:$0xff]   ;;  %v1352_v14 = vld [vmem:[%s2382_s1 + $0x60] ss:$8 sps:$4 sm:$0xff]   ;;  %v1353_v16 = vld [vmem:[%s2382_s1 + $0x74] ss:$8 sps:$4 sm:$0xff]  }
   0x6   :  { %v1382_v13 = vld [vmem:[%s2383_s0 + $0x4] ss:$8 sps:$4 sm:$0xff]   ;;  %v1355_v17 = vld [vmem:[%s2382_s1 + $0x70] ss:$8 sps:$4 sm:$0xff]   ;;  %v1358_v19 = vld [vmem:[%s2382_s1 + $0x80] ss:$8 sps:$4 sm:$0xff]  }
   0x7   :  { %457 = vmatpush1.bf16.msra.mxu0 %v1337_v3  ;;  %1317 = vmatpush1.bf16.msra.mxu1 %v1337_v3  ;;  %v1385_v15 = vld [vmem:[%s2383_s0 + $0xa4] ss:$8 sps:$4 sm:$0xff]   ;;  %v1359_v20 = vld [vmem:[%s2382_s1 + $0x94] ss:$8 sps:$4 sm:$0xff]   ;;  %v1361_v21 = vld [vmem:[%s2382_s1 + $0x90] ss:$8 sps:$4 sm:$0xff]  }
   0x8   :  { %458 = vmatprep.subr.bf16.mxu0 %v1338_v4  ;;  %1302 = vmatprep.subr.bf16.mxu1 %v1338_v4  ;;  %v1356_v18 = vld [vmem:[%s2382_s1 + $0x84] ss:$8 sps:$4 sm:$0xff]   ;;  %v1364_v23 = vld [vmem:[%s2382_s1 + $0xa0] ss:$8 sps:$4 sm:$0xff]   ;;  %v1365_v24 = vld [vmem:[%s2382_s1 + $0xb4] ss:$8 sps:$4 sm:$0xff]  }
   0x9   :  { %486 = vmatprep.mubr.bf16.mxu0 %v1382_v13  ;;  %586 = vmatprep.mubr.bf16.mxu1 %v1385_v15  ;;  %v1362_v22 = vld [vmem:[%s2382_s1 + $0xa4] ss:$8 sps:$4 sm:$0xff]   ;;  %v1367_v25 = vld [vmem:[%s2382_s1 + $0xb0] ss:$8 sps:$4 sm:$0xff]   ;;  %v1370_v27 = vld [vmem:[%s2382_s1 + $0xc0] ss:$8 sps:$4 sm:$0xff]  }
   0xa   :  { %v1368_v26 = vld [vmem:[%s2382_s1 + $0xc4] ss:$8 sps:$4 sm:$0xff]   ;;  %v1371_v28 = vld [vmem:[%s2382_s1 + $0xd4] ss:$8 sps:$4 sm:$0xff]   ;;  %v1373_v29 = vld [vmem:[%s2382_s1 + $0xd0] ss:$8 sps:$4 sm:$0xff]  }
   0xb   :  { %459 = vmatpush1.bf16.msra.mxu0 %v1340_v5  ;;  %1318 = vmatpush1.bf16.msra.mxu1 %v1340_v5  ;;  %v1374_v30 = vld [vmem:[%s2382_s1 + $0xe4] ss:$8 sps:$4 sm:$0xff]   ;;  %v1376_v31 = vld [vmem:[%s2382_s1 + $0xe0] ss:$8 sps:$4 sm:$0xff]   ;;  %v1377_v32 = vld [vmem:[%s2382_s1 + $0xf4] ss:$8 sps:$4 sm:$0xff]  }
   0xc   :  { %460 = vmatprep.subr.bf16.mxu0 %v1341_v6  ;;  %1303 = vmatprep.subr.bf16.mxu1 %v1341_v6  ;;  %v1379_v33 = vld [vmem:[%s2382_s1 + $0xf0] ss:$8 sps:$4 sm:$0xff]   ;;  %v1380_v34 = vld [vmem:[%s2383_s0] ss:$8 sps:$4 sm:$0xff]   ;;  %v1386_v36 = vld [vmem:[%s2383_s0 + $0x14] ss:$8 sps:$4 sm:$0xff]   ;;  %v94_v6 = vlaneseq }
   0xd   :  { %v1383_v35 = vld [vmem:[%s2383_s0 + $0xa0] ss:$8 sps:$4 sm:$0xff]   ;;  %v1388_v37 = vld [vmem:[%s2383_s0 + $0xb4] ss:$8 sps:$4 sm:$0xff]   ;;  %v1390_v38 = vld [vmem:[%s2383_s0 + $0x10] ss:$8 sps:$4 sm:$0xff]  }
   0xe   :  { %v1391_v39 = vld [vmem:[%s2383_s0 + $0xb0] ss:$8 sps:$4 sm:$0xff]   ;;  %v1392_v40 = vld [vmem:[%s2383_s0 + $0x24] ss:$8 sps:$4 sm:$0xff]   ;;  %v1396_v42 = vld [vmem:[%s2383_s0 + $0x20] ss:$8 sps:$4 sm:$0xff]  }
   0xf   :  { %461 = vmatpush1.bf16.msra.mxu0 %v1343_v7  ;;  %1319 = vmatpush1.bf16.msra.mxu1 %v1343_v7  ;;  %v1394_v41 = vld [vmem:[%s2383_s0 + $0xc4] ss:$8 sps:$4 sm:$0xff]   ;;  %v1397_v43 = vld [vmem:[%s2383_s0 + $0xc0] ss:$8 sps:$4 sm:$0xff]   ;;  %v1398_v44 = vld [vmem:[%s2383_s0 + $0x34] ss:$8 sps:$4 sm:$0xff]  }
  0x10   :  { %462 = vmatprep.subr.bf16.mxu0 %v1344_v8  ;;  %1304 = vmatprep.subr.bf16.mxu1 %v1344_v8  ;;  %v1400_v45 = vld [vmem:[%s2383_s0 + $0xd4] ss:$8 sps:$4 sm:$0xff]   ;;  %v1402_v46 = vld [vmem:[%s2383_s0 + $0x30] ss:$8 sps:$4 sm:$0xff]   ;;  %v1404_v48 = vld [vmem:[%s2383_s0 + $0x44] ss:$8 sps:$4 sm:$0xff]  }
  0x11   :  { %v1403_v47 = vld [vmem:[%s2383_s0 + $0xd0] ss:$8 sps:$4 sm:$0xff]   ;;  %v1406_v49 = vld [vmem:[%s2383_s0 + $0xe4] ss:$8 sps:$4 sm:$0xff]   ;;  %v1408_v50 = vld [vmem:[%s2383_s0 + $0x40] ss:$8 sps:$4 sm:$0xff]  }
  0x12   :  { %v1409_v51 = vld [vmem:[%s2383_s0 + $0xe0] ss:$8 sps:$4 sm:$0xff]   ;;  %v1410_v52 = vld [vmem:[%s2383_s0 + $0x54] ss:$8 sps:$4 sm:$0xff]   ;;  %v1414_v54 = vld [vmem:[%s2383_s0 + $0x50] ss:$8 sps:$4 sm:$0xff]  }
  0x13   :  { %463 = vmatpush1.bf16.msra.mxu0 %v1346_v9  ;;  %1320 = vmatpush1.bf16.msra.mxu1 %v1346_v9  ;;  %v1412_v53 = vld [vmem:[%s2383_s0 + $0xf4] ss:$8 sps:$4 sm:$0xff]   ;;  %v1415_v55 = vld [vmem:[%s2383_s0 + $0xf0] ss:$8 sps:$4 sm:$0xff]   ;;  %v1416_v56 = vld [vmem:[%s2383_s0 + $0x64] ss:$8 sps:$4 sm:$0xff]  }
  0x14   :  { %464 = vmatprep.subr.bf16.mxu0 %v1347_v10  ;;  %1305 = vmatprep.subr.bf16.mxu1 %v1347_v10  ;;  %v1418_v57 = vld [vmem:[%s2383_s0 + $0x104] ss:$8 sps:$4 sm:$0xff]   ;;  %v1420_v58 = vld [vmem:[%s2383_s0 + $0x60] ss:$8 sps:$4 sm:$0xff]   ;;  %v1422_v60 = vld [vmem:[%s2383_s0 + $0x74] ss:$8 sps:$4 sm:$0xff]  }
  0x15   :  { %v1421_v59 = vld [vmem:[%s2383_s0 + $0x100] ss:$8 sps:$4 sm:$0xff]   ;;  %v1424_v61 = vld [vmem:[%s2383_s0 + $0x114] ss:$8 sps:$4 sm:$0xff]   ;;  %v1426_v62 = vld [vmem:[%s2383_s0 + $0x70] ss:$8 sps:$4 sm:$0xff]  }
  0x16   :  { %v1427_v63 = vld [vmem:[%s2383_s0 + $0x110] ss:$8 sps:$4 sm:$0xff]   ;;  %v1428_v0 = vld [vmem:[%s2383_s0 + $0x84] ss:$8 sps:$4 sm:$0xff]   ;;  %v1432_v2 = vld [vmem:[%s2383_s0 + $0x80] ss:$8 sps:$4 sm:$0xff]  }
  0x17   :  { %465 = vmatpush1.bf16.msra.mxu0 %v1349_v11  ;;  %1321 = vmatpush1.bf16.msra.mxu1 %v1349_v11  ;;  %v1430_v1 = vld [vmem:[%s2383_s0 + $0x124] ss:$8 sps:$4 sm:$0xff]   ;;  %v1433_v3 = vld [vmem:[%s2383_s0 + $0x120] ss:$8 sps:$4 sm:$0xff]   ;;  %v1434_v4 = vld [vmem:[%s2383_s0 + $0x94] ss:$8 sps:$4 sm:$0xff]  }
  0x18   :  { %466 = vmatprep.subr.bf16.mxu0 %v1350_v12  ;;  %1306 = vmatprep.subr.bf16.mxu1 %v1350_v12  ;;  %v1436_v5 = vld [vmem:[%s2383_s0 + $0x90] ss:$8 sps:$4 sm:$0xff]   ;;  %v95_v7 = vshrl.u32 %v94_v6, 7  ;;  %v92_v9 = vld [vmem:[%s2384_s2] sm:$0x3] }
  0x1a   :  { %v96_v8 = vsub.s32 0, %v95_v7  ;;  %v100_v10 = vsub.s32 1, %v95_v7 }
  0x1b   :  { %467 = vmatpush1.bf16.msra.mxu0 %v1352_v14  ;;  %1322 = vmatpush1.bf16.msra.mxu1 %v1352_v14 }
  0x1c   :  { %468 = vmatprep.subr.bf16.mxu0 %v1353_v16  ;;  %1307 = vmatprep.subr.bf16.mxu1 %v1353_v16  ;;  %v1908_v11 = vrot.slane %v92_v9, %v96_v8  ;;  %v1910_v12 = vrot.slane %v92_v9, %v100_v10 }
  0x1f   :  { %469 = vmatpush1.bf16.msra.mxu0 %v1355_v17  ;;  %1323 = vmatpush1.bf16.msra.mxu1 %v1355_v17 }
  0x20   :  { %470 = vmatprep.subr.bf16.mxu0 %v1356_v18  ;;  %1308 = vmatprep.subr.bf16.mxu1 %v1356_v18 }
  0x23   :  { %471 = vmatpush1.bf16.msra.mxu0 %v1358_v19  ;;  %1324 = vmatpush1.bf16.msra.mxu1 %v1358_v19 }
  0x24   :  { %472 = vmatprep.subr.bf16.mxu0 %v1359_v20  ;;  %1309 = vmatprep.subr.bf16.mxu1 %v1359_v20 }
  0x27   :  { %473 = vmatpush1.bf16.msra.mxu0 %v1361_v21  ;;  %1325 = vmatpush1.bf16.msra.mxu1 %v1361_v21 }
  0x28   :  { %474 = vmatprep.subr.bf16.mxu0 %v1362_v22  ;;  %1310 = vmatprep.subr.bf16.mxu1 %v1362_v22 }
  0x2b   :  { %475 = vmatpush1.bf16.msra.mxu0 %v1364_v23  ;;  %1326 = vmatpush1.bf16.msra.mxu1 %v1364_v23 }
  0x2c   :  { %476 = vmatprep.subr.bf16.mxu0 %v1365_v24  ;;  %1311 = vmatprep.subr.bf16.mxu1 %v1365_v24 }
  0x2f   :  { %477 = vmatpush1.bf16.msra.mxu0 %v1367_v25  ;;  %1327 = vmatpush1.bf16.msra.mxu1 %v1367_v25 }
  0x30   :  { %478 = vmatprep.subr.bf16.mxu0 %v1368_v26  ;;  %1312 = vmatprep.subr.bf16.mxu1 %v1368_v26 }
  0x33   :  { %479 = vmatpush1.bf16.msra.mxu0 %v1370_v27  ;;  %1328 = vmatpush1.bf16.msra.mxu1 %v1370_v27 }
  0x34   :  { %480 = vmatprep.subr.bf16.mxu0 %v1371_v28  ;;  %1313 = vmatprep.subr.bf16.mxu1 %v1371_v28 }
  0x37   :  { %481 = vmatpush1.bf16.msra.mxu0 %v1373_v29  ;;  %1329 = vmatpush1.bf16.msra.mxu1 %v1373_v29 }
  0x38   :  { %482 = vmatprep.subr.bf16.mxu0 %v1374_v30  ;;  %1314 = vmatprep.subr.bf16.mxu1 %v1374_v30 }
  0x3b   :  { %483 = vmatpush1.bf16.msra.mxu0 %v1376_v31  ;;  %1330 = vmatpush1.bf16.msra.mxu1 %v1376_v31 }
  0x3c   :  { %484 = vmatprep.subr.bf16.mxu0 %v1377_v32  ;;  %1315 = vmatprep.subr.bf16.mxu1 %v1377_v32 }
  0x3f   :  { %485 = vmatpush1.bf16.msra.mxu0 %v1379_v33  ;;  %1331 = vmatpush1.bf16.msra.mxu1 %v1379_v33 }
  0x42   :  { %487 = vmatmul.mubr.bf16.vlgmr.msra.gmra.mrb[0].mxu0 %v1380_v34  ;;  %587 = vmatmul.mubr.bf16.vlgmr.msra.gmra.mrb[0].mxu1 %v1383_v35 }
  0x43   :  { %496 = vmatprep.mubr.bf16.mxu0 %v1386_v36  ;;  %596 = vmatprep.mubr.bf16.mxu1 %v1388_v37 }
  0x4a   :  { %497 = vmatmul.mubr.bf16.gmra.mrb[4].mxu0 %v1390_v38  ;;  %597 = vmatmul.mubr.bf16.gmra.mrb[4].mxu1 %v1391_v39 }
  0x4b   :  { %506 = vmatprep.mubr.bf16.mxu0 %v1392_v40  ;;  %606 = vmatprep.mubr.bf16.mxu1 %v1394_v41 }
  0x52   :  { %507 = vmatmul.mubr.bf16.gmra.mrb[8].mxu0 %v1396_v42  ;;  %607 = vmatmul.mubr.bf16.gmra.mrb[8].mxu1 %v1397_v43 }
  0x53   :  { %516 = vmatprep.mubr.bf16.mxu0 %v1398_v44  ;;  %616 = vmatprep.mubr.bf16.mxu1 %v1400_v45 }
  0x5a   :  { %517 = vmatmul.mubr.bf16.gmra.mrb[12].mxu0 %v1402_v46  ;;  %617 = vmatmul.mubr.bf16.gmra.mrb[12].mxu1 %v1403_v47 }
  0x5b   :  { %526 = vmatprep.mubr.bf16.mxu0 %v1404_v48  ;;  %626 = vmatprep.mubr.bf16.mxu1 %v1406_v49 }
  0x62   :  { %527 = vmatmul.mubr.bf16.gmra.mrb[16].mxu0 %v1408_v50  ;;  %627 = vmatmul.mubr.bf16.gmra.mrb[16].mxu1 %v1409_v51 }
  0x63   :  { %536 = vmatprep.mubr.bf16.mxu0 %v1410_v52  ;;  %636 = vmatprep.mubr.bf16.mxu1 %v1412_v53 }
  0x6a   :  { %537 = vmatmul.mubr.bf16.gmra.mrb[20].mxu0 %v1414_v54  ;;  %637 = vmatmul.mubr.bf16.gmra.mrb[20].mxu1 %v1415_v55  ;;  %v10_v54 = vstv %s2385_s4 }
  0x6b   :  { %546 = vmatprep.mubr.bf16.mxu0 %v1416_v56  ;;  %646 = vmatprep.mubr.bf16.mxu1 %v1418_v57  ;;  %11 = vst [vmem:[#allocation2] sm:$0x1] %v10_v54 }
  0x72   :  { %547 = vmatmul.mubr.bf16.gmra.mrb[24].mxu0 %v1420_v58  ;;  %647 = vmatmul.mubr.bf16.gmra.mrb[24].mxu1 %v1421_v59 }
  0x73   :  { %556 = vmatprep.mubr.bf16.mxu0 %v1422_v60  ;;  %656 = vmatprep.mubr.bf16.mxu1 %v1424_v61 }
  0x7a   :  { %557 = vmatmul.mubr.bf16.gmra.mrb[28].mxu0 %v1426_v62  ;;  %657 = vmatmul.mubr.bf16.gmra.mrb[28].mxu1 %v1427_v63 }
  0x7b   :  { %566 = vmatprep.mubr.bf16.mxu0 %v1428_v0  ;;  %666 = vmatprep.mubr.bf16.mxu1 %v1430_v1 }
  0x82   :  { %567 = vmatmul.mubr.bf16.gmra.mrb[32].mxu0 %v1432_v2  ;;  %667 = vmatmul.mubr.bf16.gmra.mrb[32].mxu1 %v1433_v3 }
  0x83   :  { %576 = vmatprep.mubr.bf16.mxu0 %v1434_v4 }
  0x8a   :  { %577 = vmatmul.mubr.bf16.gmra.mrb[36].mxu0 %v1436_v5 }
 0x115   :  { %v488_v13 = vpop.f32.mrb[0].mxu0  ;;  %v588_v14 = vpop.f32.mrb[0].mxu1 }
 0x116   :  { %v489_v15 = vadd.f32 %v488_v13, %v1908_v11  ;;  %v490_v16 = vpop.f32.mrb[1].mxu0  ;;  %v590_v17 = vpop.f32.mrb[1].mxu1  ;;  %v589_v24 = vadd.f32 %v588_v14, %v1908_v11 }
 0x117   :  { %v491_v18 = vadd.f32 %v490_v16, %v1910_v12  ;;  %v591_v19 = vadd.f32 %v590_v17, %v1910_v12  ;;  %v492_v20 = vpop.f32.mrb[2].mxu0  ;;  %v592_v21 = vpop.f32.mrb[2].mxu1 }
 0x118   :  { %v494_v22 = vpop.f32.mrb[3].mxu0  ;;  %v594_v23 = vpop.f32.mrb[3].mxu1  ;;  %1437 = vtanh.f32 %v489_v15  ;;  %v493_v30 = vadd.f32 %v492_v20, %v1908_v11  ;;  %v593_v34 = vadd.f32 %v592_v21, %v1908_v11 }
 0x119   :  { %v1260_v25 = vmul.f32 -1.442695, %v491_v18  ;;  %v1280_v26 = vmul.f32 -1.442695, %v591_v19  ;;  %v495_v27 = vadd.f32 %v494_v22, %v1910_v12  ;;  %v595_v28 = vadd.f32 %v594_v23, %v1910_v12 }
 0x11b   :  { %1439 = vpow2.f32 %v1260_v25  ;;  %v1261_v29 = vmul.f32 -1.442695, %v495_v27  ;;  %v1281_v31 = vmul.f32 -1.442695, %v595_v28 }
 0x11c   :  { %1441 = vpow2.f32 %v1280_v26 }
 0x11d   :  { %1443 = vtanh.f32 %v589_v24  ;;  %v498_v32 = vpop.f32.mrb[4].mxu0  ;;  %v598_v33 = vpop.f32.mrb[4].mxu1 }
 0x11e   :  { %1445 = vpow2.f32 %v1261_v29  ;;  %v500_v35 = vpop.f32.mrb[5].mxu0  ;;  %v600_v36 = vpop.f32.mrb[5].mxu1  ;;  %v499_v43 = vadd.f32 %v498_v32, %v1908_v11  ;;  %v599_v57 = vadd.f32 %v598_v33, %v1908_v11 }
 0x11f   :  { %1447 = vpow2.f32 %v1281_v31  ;;  %v501_v37 = vadd.f32 %v500_v35, %v1910_v12  ;;  %v601_v38 = vadd.f32 %v600_v36, %v1910_v12  ;;  %v502_v39 = vpop.f32.mrb[6].mxu0  ;;  %v602_v40 = vpop.f32.mrb[6].mxu1 }
 0x120   :  { %1449 = vtanh.f32 %v493_v30  ;;  %v504_v41 = vpop.f32.mrb[7].mxu0  ;;  %v604_v42 = vpop.f32.mrb[7].mxu1  ;;  %v503_v7 = vadd.f32 %v502_v39, %v1908_v11  ;;  %v603_v20 = vadd.f32 %v602_v40, %v1908_v11  ;;  %v1960_v39 = vld [vmem:[%s2386_s3] ss:$0 sm:$0xff] }
 0x121   :  { %v1262_v44 = vmul.f32 -1.442695, %v501_v37  ;;  %v1282_v45 = vmul.f32 -1.442695, %v601_v38  ;;  %v505_v46 = vadd.f32 %v504_v41, %v1910_v12  ;;  %1451 = vtanh.f32 %v593_v34 }
 0x122   :  { %v605_v47 = vadd.f32 %v604_v42, %v1910_v12  ;;  %v1925_v49 = vpop.eup %1437 }
 0x123   :  { %1453 = vpow2.f32 %v1262_v44  ;;  %v1263_v48 = vmul.f32 -1.442695, %v505_v46 }
 0x124   :  { %1455 = vpow2.f32 %v1282_v45  ;;  %v1283_v50 = vmul.f32 -1.442695, %v605_v47 }
 0x125   :  { %v1440_v51 = vpop.eup %1439  ;;  %1457 = vtanh.f32 %v499_v43  ;;  %v508_v52 = vpop.f32.mrb[8].mxu0 }
 0x126   :  { %v1927_v53 = vpop.f32.mrb[8].mxu1  ;;  %v1442_v55 = vpop.eup %1441  ;;  %v829_v56 = vadd.f32 1.0, %v1440_v51  ;;  %1459 = vpow2.f32 %v1263_v48  ;;  %v509_v30 = vadd.f32 %v508_v52, %v1908_v11 }
 0x127   :  { %v510_v58 = vpop.f32.mrb[9].mxu0  ;;  %v610_v59 = vpop.f32.mrb[9].mxu1  ;;  %v849_v61 = vadd.f32 1.0, %v1442_v55  ;;  %1461 = vpow2.f32 %v1283_v50  ;;  %v609_v44 = vadd.f32 %v1927_v53, %v1908_v11 }
 0x128   :  { %v1444_v60 = vpop.eup %1443  ;;  %v511_v62 = vadd.f32 %v510_v58, %v1910_v12  ;;  %v611_v63 = vadd.f32 %v610_v59, %v1910_v12  ;;  %v1935_v0 = vpop.f32.mrb[10].mxu0  ;;  %1463 = vrcp.f32 %v829_v56 }
 0x129   :  { %v1937_v1 = vpop.f32.mrb[10].mxu1  ;;  %v1446_v2 = vpop.eup %1445  ;;  %1465 = vrcp.f32 %v849_v61 }
 0x12a   :  { %v514_v3 = vpop.f32.mrb[11].mxu0  ;;  %v614_v4 = vpop.f32.mrb[11].mxu1  ;;  %v830_v6 = vadd.f32 1.0, %v1446_v2  ;;  %1467 = vtanh.f32 %v599_v57  ;;  %v1264_v10 = vmul.f32 -1.442695, %v511_v62 }
 0x12b   :  { %v1448_v5 = vpop.eup %1447  ;;  %v1284_v13 = vmul.f32 -1.442695, %v611_v63  ;;  %v515_v21 = vadd.f32 %v514_v3, %v1910_v12  ;;  %v615_v26 = vadd.f32 %v614_v4, %v1910_v12 }
 0x12c   :  { %v1940_v8 = vpop.eup %1449  ;;  %v850_v9 = vadd.f32 1.0, %v1448_v5  ;;  %1469 = vrcp.f32 %v830_v6 }
 0x12d   :  { %v1452_v14 = vpop.eup %1451  ;;  %v1942_v16 = vpop.f32.mrb[12].mxu0  ;;  %v1265_v37 = vmul.f32 -1.442695, %v515_v21  ;;  %v1285_v41 = vmul.f32 -1.442695, %v615_v26 }
 0x12e   :  { %1471 = vrcp.f32 %v850_v9  ;;  %v1454_v15 = vpop.eup %1453  ;;  %v1944_v17 = vpop.f32.mrb[12].mxu1 }
 0x12f   :  { %1473 = vtanh.f32 %v503_v7  ;;  %v1456_v18 = vpop.eup %1455  ;;  %v831_v19 = vadd.f32 1.0, %v1454_v15  ;;  %v520_v22 = vpop.f32.mrb[13].mxu0 }
 0x130   :  { %1475 = vpow2.f32 %v1264_v10  ;;  %v620_v23 = vpop.f32.mrb[13].mxu1  ;;  %v1948_v24 = vpop.eup %1457  ;;  %v851_v25 = vadd.f32 1.0, %v1456_v18  ;;  %v521_v38 = vadd.f32 %v520_v22, %v1910_v12  ;;  %v513_v10 = vadd.f32 %v1935_v0, %v1908_v11 }
 0x131   :  { %1477 = vpow2.f32 %v1284_v13  ;;  %v1951_v27 = vpop.f32.mrb[14].mxu0  ;;  %v1953_v28 = vpop.f32.mrb[14].mxu1  ;;  %v621_v47 = vadd.f32 %v620_v23, %v1910_v12 }
 0x132   :  { %v1460_v29 = vpop.eup %1459  ;;  %1479 = vrcp.f32 %v831_v19  ;;  %v524_v31 = vpop.f32.mrb[15].mxu0  ;;  %v1266_v54 = vmul.f32 -1.442695, %v521_v38 }
 0x133   :  { %v624_v32 = vpop.f32.mrb[15].mxu1  ;;  %v1462_v33 = vpop.eup %1461  ;;  %1481 = vrcp.f32 %v851_v25  ;;  %v832_v34 = vadd.f32 1.0, %v1460_v29  ;;  %v1286_v4 = vmul.f32 -1.442695, %v621_v47 }
 0x134   :  { %v1464_v35 = vpop.eup %1463  ;;  %1483 = vtanh.f32 %v603_v20  ;;  %v852_v36 = vadd.f32 1.0, %v1462_v33  ;;  %v625_v5 = vadd.f32 %v624_v32, %v1910_v12 }
 0x135   :  { %v1466_v40 = vpop.eup %1465  ;;  %1485 = vrcp.f32 %v832_v34  ;;  %v943_v42 = vmul.f32 %v1464_v35, %v1925_v49  ;;  %v1966_v48 = vpop.f32.mrb[16].mxu0 }
 0x136   :  { %v1468_v43 = vpop.eup %1467  ;;  %1487 = vtanh.f32 %v509_v30  ;;  %v963_v45 = vmul.f32 %v1466_v40, %v1444_v60  ;;  %v1968_v50 = vpop.f32.mrb[16].mxu1  ;;  %v525_v60 = vadd.f32 %v524_v31, %v1910_v12  ;;  %v1287_v22 = vmul.f32 -1.442695, %v625_v5 }
 0x137   :  { %v1470_v46 = vpop.eup %1469  ;;  %1489 = vrcp.f32 %v852_v36  ;;  %v988_v51 = vmul.f32 %v1960_v39, %v943_v42  ;;  %v530_v49 = vpop.f32.mrb[17].mxu0  ;;  %v619_v42 = vadd.f32 %v1944_v17, %v1908_v11 }
 0x138   :  { %v1472_v52 = vpop.eup %1471  ;;  %1491 = vpow2.f32 %v1265_v37  ;;  %v630_v55 = vpop.f32.mrb[17].mxu1  ;;  %v944_v63 = vmul.f32 %v1470_v46, %v1940_v8  ;;  %v1008_v6 = vmul.f32 %v1960_v39, %v963_v45  ;;  %v1267_v19 = vmul.f32 -1.442695, %v525_v60 }
 0x139   :  { %v1474_v56 = vpop.eup %1473  ;;  %1493 = vpow2.f32 %v1285_v41  ;;  %v1971_v57 = vpop.f32.mrb[18].mxu0  ;;  %1026 = vadd.xlane.f32.xlu0 %v988_v51  ;;  %v964_v58 = vmul.f32 %v1472_v52, %v1452_v14  ;;  %v613_v14 = vadd.f32 %v1937_v1, %v1908_v11  ;;  %v531_v29 = vadd.f32 %v530_v49, %v1910_v12 }
 0x13a   :  { %v1973_v53 = vpop.f32.mrb[18].mxu1  ;;  %v1476_v59 = vpop.eup %1475  ;;  %1495 = vtanh.f32 %v609_v44  ;;  %v989_v1 = vmul.f32 %v1960_v39, %v944_v63  ;;  %v631_v37 = vadd.f32 %v630_v55, %v1910_v12  ;;  %v623_v63 = vadd.f32 %v1953_v28, %v1908_v11 }
 0x13b   :  { %v1976_v61 = vpop.f32.mrb[19].mxu0  ;;  %v1978_v62 = vpop.f32.mrb[19].mxu1  ;;  %v833_v3 = vadd.f32 1.0, %v1476_v59  ;;  %1497 = vpow2.f32 %v1266_v54  ;;  %v1009_v8 = vmul.f32 %v1960_v39, %v964_v58  ;;  %v1268_v46 = vmul.f32 -1.442695, %v531_v29 }
 0x13c   :  { %v1478_v2 = vpop.eup %1477  ;;  %v1288_v54 = vmul.f32 -1.442695, %v631_v37  ;;  %v535_v49 = vadd.f32 %v1976_v61, %v1910_v12 }
 0x13d   :  { %v1480_v7 = vpop.eup %1479  ;;  %v853_v9 = vadd.f32 1.0, %v1478_v2  ;;  %1499 = vrcp.f32 %v833_v3  ;;  %1066 = vadd.xlane.f32.xlu0 %v1008_v6  ;;  %1068 = vadd.xlane.f32.xlu1 %v1009_v8  ;;  %v1989_v0 = vpop.f32.mrb[20].mxu0 }
 0x13e   :  { %v1482_v13 = vpop.eup %1481  ;;  %v945_v15 = vmul.f32 %v1480_v7, %v1948_v24  ;;  %v1991_v23 = vpop.f32.mrb[20].mxu1  ;;  %v519_v24 = vadd.f32 %v1942_v16, %v1908_v11 }
 0x13f   :  { %v1484_v18 = vpop.eup %1483  ;;  %1501 = vrcp.f32 %v853_v9  ;;  %v965_v20 = vmul.f32 %v1482_v13, %v1468_v43  ;;  %v1998_v30 = vpop.f32.mrb[21].mxu0  ;;  %v1269_v13 = vmul.f32 -1.442695, %v535_v49 }
 0x140   :  { %v1486_v21 = vpop.eup %1485  ;;  %1503 = vpow2.f32 %v1286_v4  ;;  %v990_v25 = vmul.f32 %v1960_v39, %v945_v15  ;;  %v2000_v31 = vpop.f32.mrb[21].mxu1 }
 0x141   :  { %v1488_v26 = vpop.eup %1487  ;;  %1505 = vtanh.f32 %v513_v10  ;;  %v946_v32 = vmul.f32 %v1486_v21, %v1474_v56  ;;  %v2002_v34 = vpop.f32.mrb[22].mxu0  ;;  %1028 = vadd.xlane.f32.xlu0 %v989_v1  ;;  %v1010_v43 = vmul.f32 %v1960_v39, %v965_v20  ;;  %v523_v56 = vadd.f32 %v1951_v27, %v1908_v11 }
 0x142   :  { %v1490_v33 = vpop.eup %1489  ;;  %1507 = vtanh.f32 %v613_v14  ;;  %v2004_v35 = vpop.f32.mrb[22].mxu1  ;;  %1030 = vadd.xlane.f32.xlu1 %v990_v25  ;;  %v635_v27 = vadd.f32 %v1978_v62, %v1910_v12 }
 0x143   :  { %v1492_v36 = vpop.eup %1491  ;;  %1509 = vpow2.f32 %v1267_v19  ;;  %v2007_v38 = vpop.f32.mrb[23].mxu0  ;;  %v991_v47 = vmul.f32 %v1960_v39, %v946_v32  ;;  %v966_v51 = vmul.f32 %v1490_v33, %v1484_v18  ;;  %v541_v19 = vadd.f32 %v1998_v30, %v1910_v12 }
 0x144   :  { %v2009_v16 = vpop.f32.mrb[23].mxu1  ;;  %v1494_v40 = vpop.eup %1493  ;;  %v834_v41 = vadd.f32 1.0, %v1492_v36  ;;  %1511 = vpow2.f32 %v1287_v22  ;;  %v1289_v22 = vmul.f32 -1.442695, %v635_v27  ;;  %v629_v32 = vadd.f32 %v1968_v50, %v1908_v11 }
 0x145   :  { %v1496_v44 = vpop.eup %1495  ;;  %v854_v45 = vadd.f32 1.0, %v1494_v40  ;;  %1513 = vtanh.f32 %v519_v24  ;;  %1070 = vadd.xlane.f32.xlu0 %v1010_v43  ;;  %v2019_v58 = vpop.f32.mrb[24].mxu0  ;;  %v1011_v7 = vmul.f32 %v1960_v39, %v966_v51  ;;  %v641_v24 = vadd.f32 %v2000_v31, %v1910_v12 }
 0x146   :  { %1515 = vrcp.f32 %v834_v41  ;;  %v1498_v52 = vpop.eup %1497  ;;  %1032 = vadd.xlane.f32.xlu1 %v991_v47  ;;  %v2021_v59 = vpop.f32.mrb[24].mxu1  ;;  %v1270_v40 = vmul.f32 -1.442695, %v541_v19  ;;  %v545_v47 = vadd.f32 %v2007_v38, %v1910_v12 }
 0x147   :  { %1517 = vrcp.f32 %v854_v45  ;;  %v1500_v17 = vpop.eup %1499  ;;  %v835_v55 = vadd.f32 1.0, %v1498_v52  ;;  %v2025_v2 = vpop.f32.mrb[25].mxu0 }
 0x148   :  { %1519 = vtanh.f32 %v619_v42  ;;  %v2027_v3 = vpop.f32.mrb[25].mxu1  ;;  %v947_v61 = vmul.f32 %v1500_v17, %v1488_v26  ;;  %v2031_v5 = vpop.f32.mrb[26].mxu0  ;;  %v529_v26 = vadd.f32 %v1966_v48, %v1908_v11 }
 0x149   :  { %v1502_v60 = vpop.eup %1501  ;;  %1521 = vpow2.f32 %v1268_v46  ;;  %v2033_v6 = vpop.f32.mrb[26].mxu1  ;;  %v1290_v46 = vmul.f32 -1.442695, %v641_v24 }
 0x14a   :  { %v1504_v4 = vpop.eup %1503  ;;  %1523 = vrcp.f32 %v835_v55  ;;  %v967_v9 = vmul.f32 %v1502_v60, %v1496_v44  ;;  %v2036_v14 = vpop.f32.mrb[27].mxu0  ;;  %1072 = vadd.xlane.f32.xlu1 %v1011_v7  ;;  %v992_v62 = vmul.f32 %v1960_v39, %v947_v61  ;;  %v645_v60 = vadd.f32 %v2009_v16, %v1910_v12 }
 0x14b   :  { %v1506_v10 = vpop.eup %1505  ;;  %v855_v28 = vadd.f32 1.0, %v1504_v4  ;;  %1525 = vpow2.f32 %v1288_v54  ;;  %v2038_v8 = vpop.f32.mrb[27].mxu1  ;;  %v633_v4 = vadd.f32 %v1973_v53, %v1908_v11  ;;  %v1271_v7 = vmul.f32 -1.442695, %v545_v47 }
 0x14c   :  { %v1508_v15 = vpop.eup %1507  ;;  %1527 = vtanh.f32 %v523_v56  ;;  %1034 = vadd.xlane.f32.xlu0 %v992_v62  ;;  %v1012_v30 = vmul.f32 %v1960_v39, %v967_v9  ;;  %v533_v56 = vadd.f32 %v1971_v57, %v1908_v11  ;;  %v1291_v62 = vmul.f32 -1.442695, %v645_v60 }
 0x14d   :  { %v1510_v18 = vpop.eup %1509  ;;  %1529 = vrcp.f32 %v855_v28  ;;  %v2050_v33 = vpop.f32.mrb[28].mxu0  ;;  %v551_v53 = vadd.f32 %v2025_v2, %v1910_v12  ;;  %v651_v2 = vadd.f32 %v2027_v3, %v1910_v12  ;;  %v655_v60 = vadd.f32 %v2038_v8, %v1910_v12 }
 0x14e   :  { %v1512_v20 = vpop.eup %1511  ;;  %1531 = vtanh.f32 %v623_v63  ;;  %v836_v21 = vadd.f32 1.0, %v1510_v18  ;;  %v2052_v36 = vpop.f32.mrb[28].mxu1 }
 0x14f   :  { %v1514_v25 = vpop.eup %1513  ;;  %v856_v1 = vadd.f32 1.0, %v1512_v20  ;;  %1533 = vpow2.f32 %v1269_v13  ;;  %v2054_v48 = vpop.f32.mrb[29].mxu0  ;;  %v1292_v47 = vmul.f32 -1.442695, %v651_v2 }
 0x150   :  { %v1516_v29 = vpop.eup %1515  ;;  %1535 = vrcp.f32 %v836_v21  ;;  %v2056_v42 = vpop.f32.mrb[29].mxu1  ;;  %1074 = vadd.xlane.f32.xlu0 %v1012_v30 }
 0x151   :  { %v1518_v37 = vpop.eup %1517  ;;  %1537 = vrcp.f32 %v856_v1  ;;  %v948_v41 = vmul.f32 %v1516_v29, %v1506_v10  ;;  %v2058_v43 = vpop.f32.mrb[30].mxu0 }
 0x152   :  { %v1520_v31 = vpop.eup %1519  ;;  %1539 = vpow2.f32 %v1289_v22  ;;  %v2060_v50 = vpop.f32.mrb[30].mxu1  ;;  %v968_v44 = vmul.f32 %v1518_v37, %v1508_v15  ;;  %v539_v22 = vadd.f32 %v1989_v0, %v1908_v11  ;;  %v639_v0 = vadd.f32 %v1991_v23, %v1908_v11 }
 0x153   :  { %v1522_v45 = vpop.eup %1521  ;;  %1541 = vtanh.f32 %v529_v26  ;;  %v993_v51 = vmul.f32 %v1960_v39, %v948_v41  ;;  %v2065_v52 = vpop.f32.mrb[31].mxu0 }
 0x154   :  { %v2067_v54 = vpop.f32.mrb[31].mxu1  ;;  %v1524_v49 = vpop.eup %1523  ;;  %1543 = vtanh.f32 %v629_v32  ;;  %v837_v17 = vadd.f32 1.0, %v1522_v45  ;;  %v1013_v9 = vmul.f32 %v1960_v39, %v968_v44  ;;  %v1272_v44 = vmul.f32 -1.442695, %v551_v53 }
 0x155   :  { %v1526_v55 = vpop.eup %1525  ;;  %1545 = vpow2.f32 %v1270_v40  ;;  %1036 = vadd.xlane.f32.xlu1 %v993_v51  ;;  %v949_v63 = vmul.f32 %v1524_v49, %v1514_v25  ;;  %v2077_v13 = vpop.f32.mrb[32].mxu0  ;;  %v555_v51 = vadd.f32 %v2036_v14, %v1910_v12  ;;  %v561_v53 = vadd.f32 %v2054_v48, %v1910_v12 }
 0x156   :  { %v1528_v38 = vpop.eup %1527  ;;  %1547 = vrcp.f32 %v837_v17  ;;  %v857_v61 = vadd.f32 1.0, %v1526_v55  ;;  %v2079_v16 = vpop.f32.mrb[32].mxu1  ;;  %v543_v17 = vadd.f32 %v2002_v34, %v1908_v11  ;;  %v649_v48 = vadd.f32 %v2021_v59, %v1908_v11 }
 0x157   :  { %v1530_v27 = vpop.eup %1529  ;;  %1549 = vpow2.f32 %v1290_v46  ;;  %v994_v10 = vmul.f32 %v1960_v39, %v949_v63  ;;  %v2083_v18 = vpop.f32.mrb[33].mxu0  ;;  %v553_v59 = vadd.f32 %v2031_v5, %v1908_v11 }
 0x158   :  { %v1532_v57 = vpop.eup %1531  ;;  %1551 = vrcp.f32 %v857_v61  ;;  %v969_v28 = vmul.f32 %v1530_v27, %v1520_v31  ;;  %v2085_v19 = vpop.f32.mrb[33].mxu1  ;;  %v643_v27 = vadd.f32 %v2004_v35, %v1908_v11 }
 0x159   :  { %v1534_v15 = vpop.eup %1533  ;;  %1553 = vtanh.f32 %v533_v56  ;;  %1076 = vadd.xlane.f32.xlu1 %v1013_v9  ;;  %1038 = vadd.xlane.f32.xlu0 %v994_v10  ;;  %v2089_v25 = vpop.f32.mrb[34].mxu0  ;;  %v1273_v9 = vmul.f32 -1.442695, %v555_v51  ;;  %v665_v51 = vadd.f32 %v2067_v54, %v1910_v12 }
 0x15a   :  { %v1536_v20 = vpop.eup %1535  ;;  %1555 = vtanh.f32 %v633_v4  ;;  %v838_v21 = vadd.f32 1.0, %v1534_v15  ;;  %v2091_v1 = vpop.f32.mrb[34].mxu1  ;;  %v1014_v29 = vmul.f32 %v1960_v39, %v969_v28 }
 0x15b   :  { %v1538_v26 = vpop.eup %1537  ;;  %1557 = vpow2.f32 %v1271_v7  ;;  %v950_v24 = vmul.f32 %v1536_v20, %v1528_v38  ;;  %v2096_v32 = vpop.f32.mrb[35].mxu0  ;;  %v1295_v54 = vmul.f32 -1.442695, %v665_v51 }
 0x15c   :  { %v2098_v30 = vpop.f32.mrb[35].mxu1  ;;  %v1540_v37 = vpop.eup %1539  ;;  %1559 = vrcp.f32 %v838_v21  ;;  %v970_v40 = vmul.f32 %v1538_v26, %v1532_v57  ;;  %v549_v21 = vadd.f32 %v2019_v58, %v1908_v11  ;;  %v661_v26 = vadd.f32 %v2056_v42, %v1910_v12 }
 0x15d   :  { %v1542_v41 = vpop.eup %1541  ;;  %v858_v31 = vadd.f32 1.0, %v1540_v37  ;;  %1561 = vpow2.f32 %v1291_v62  ;;  %v995_v45 = vmul.f32 %v1960_v39, %v950_v24  ;;  %1078 = vadd.xlane.f32.xlu0 %v1014_v29  ;;  %v2107_v55 = vpop.f32.mrb[36].mxu0  ;;  %v1293_v62 = vmul.f32 -1.442695, %v655_v60 }
 0x15e   :  { %v1544_v3 = vpop.eup %1543  ;;  %1563 = vtanh.f32 %v539_v22  ;;  %v1015_v63 = vmul.f32 %v1960_v39, %v970_v40  ;;  %v2112_v61 = vpop.f32.mrb[37].mxu0  ;;  %v1274_v40 = vmul.f32 -1.442695, %v561_v53  ;;  %v1294_v42 = vmul.f32 -1.442695, %v661_v26 }
 0x15f   :  { %v1546_v46 = vpop.eup %1545  ;;  %1565 = vrcp.f32 %v858_v31  ;;  %1040 = vadd.xlane.f32.xlu1 %v995_v45  ;;  %v2116_v7 = vpop.f32.mrb[38].mxu0  ;;  %v565_v45 = vadd.f32 %v2065_v52, %v1910_v12  ;;  %v653_v52 = vadd.f32 %v2033_v6, %v1908_v11  ;;  %v559_v6 = vadd.f32 %v2050_v33, %v1908_v11 }
 0x160   :  { %v1548_v49 = vpop.eup %1547  ;;  %1567 = vtanh.f32 %v639_v0  ;;  %v839_v23 = vadd.f32 1.0, %v1546_v46  ;;  %v2119_v57 = vpop.f32.mrb[39].mxu0 }
 0x161   :  { %v1550_v56 = vpop.eup %1549  ;;  %1569 = vpow2.f32 %v1272_v44  ;;  %v951_v38 = vmul.f32 %v1548_v49, %v1542_v41 }
 0x162   :  { %v1552_v14 = vpop.eup %1551  ;;  %1571 = vrcp.f32 %v839_v23  ;;  %v859_v4 = vadd.f32 1.0, %v1550_v56 }
 0x163   :  { %v1554_v34 = vpop.eup %1553  ;;  %1573 = vpow2.f32 %v1292_v47  ;;  %1080 = vadd.xlane.f32.xlu1 %v1015_v63  ;;  %v996_v10 = vmul.f32 %v1960_v39, %v951_v38  ;;  %v971_v8 = vmul.f32 %v1552_v14, %v1544_v3  ;;  %v1275_v63 = vmul.f32 -1.442695, %v565_v45 }
 0x164   :  { %v1556_v28 = vpop.eup %1555  ;;  %1575 = vrcp.f32 %v859_v4 }
 0x165   :  { %v1558_v15 = vpop.eup %1557  ;;  %1577 = vtanh.f32 %v543_v17  ;;  %1042 = vadd.xlane.f32.xlu0 %v996_v10  ;;  %v1016_v24 = vmul.f32 %v1960_v39, %v971_v8  ;;  %v671_v8 = vadd.f32 %v2085_v19, %v1910_v12 }
 0x166   :  { %v1560_v35 = vpop.eup %1559  ;;  %1579 = vtanh.f32 %v643_v27  ;;  %v840_v20 = vadd.f32 1.0, %v1558_v15  ;;  %v571_v27 = vadd.f32 %v2083_v18, %v1910_v12  ;;  %v659_v18 = vadd.f32 %v2052_v36, %v1908_v11 }
 0x167   :  { %v1562_v22 = vpop.eup %1561  ;;  %1581 = vpow2.f32 %v1273_v9  ;;  %v952_v2 = vmul.f32 %v1560_v35, %v1554_v34  ;;  %v1296_v19 = vmul.f32 -1.442695, %v671_v8  ;;  %v563_v36 = vadd.f32 %v2058_v43, %v1908_v11 }
 0x168   :  { %v1564_v29 = vpop.eup %1563  ;;  %1583 = vrcp.f32 %v840_v20  ;;  %v860_v37 = vadd.f32 1.0, %v1562_v22  ;;  %v1276_v20 = vmul.f32 -1.442695, %v571_v27 }
 0x169   :  { %v1566_v0 = vpop.eup %1565  ;;  %1585 = vpow2.f32 %v1293_v62  ;;  %v997_v41 = vmul.f32 %v1960_v39, %v952_v2  ;;  %1082 = vadd.xlane.f32.xlu0 %v1016_v24  ;;  %v575_v2 = vadd.f32 %v2096_v32, %v1910_v12  ;;  %v663_v32 = vadd.f32 %v2060_v50, %v1908_v11 }
 0x16a   :  { %v1568_v58 = vpop.eup %1567  ;;  %1587 = vrcp.f32 %v860_v37  ;;  %v972_v31 = vmul.f32 %v1566_v0, %v1556_v28  ;;  %v569_v50 = vadd.f32 %v2077_v13, %v1908_v11 }
 0x16b   :  { %v1570_v44 = vpop.eup %1569  ;;  %1589 = vtanh.f32 %v549_v21  ;;  %1044 = vadd.xlane.f32.xlu1 %v997_v41 }
 0x16c   :  { %v1572_v3 = vpop.eup %1571  ;;  %1591 = vtanh.f32 %v649_v48  ;;  %v841_v46 = vadd.f32 1.0, %v1570_v44  ;;  %v1017_v49 = vmul.f32 %v1960_v39, %v972_v31  ;;  %v675_v48 = vadd.f32 %v2098_v30, %v1910_v12 }
 0x16d   :  { %v1574_v47 = vpop.eup %1573  ;;  %1593 = vpow2.f32 %v1274_v40  ;;  %v953_v23 = vmul.f32 %v1572_v3, %v1564_v29  ;;  %v1277_v44 = vmul.f32 -1.442695, %v575_v2  ;;  %v581_v30 = vadd.f32 %v2112_v61, %v1910_v12 }
 0x16e   :  { %v1576_v17 = vpop.eup %1575  ;;  %1595 = vrcp.f32 %v841_v46  ;;  %v861_v56 = vadd.f32 1.0, %v1574_v47  ;;  %v1297_v46 = vmul.f32 -1.442695, %v675_v48 }
 0x16f   :  { %v1578_v60 = vpop.eup %1577  ;;  %1597 = vpow2.f32 %v1294_v42  ;;  %1084 = vadd.xlane.f32.xlu1 %v1017_v49  ;;  %v998_v5 = vmul.f32 %v1960_v39, %v953_v23  ;;  %v973_v38 = vmul.f32 %v1576_v17, %v1568_v58  ;;  %v585_v49 = vadd.f32 %v2119_v57, %v1910_v12 }
 0x170   :  { %v1580_v14 = vpop.eup %1579  ;;  %1599 = vrcp.f32 %v861_v56 }
 0x171   :  { %v1582_v4 = vpop.eup %1581  ;;  %1601 = vtanh.f32 %v553_v59  ;;  %1046 = vadd.xlane.f32.xlu0 %v998_v5  ;;  %v1018_v15 = vmul.f32 %v1960_v39, %v973_v38  ;;  %v1279_v12 = vmul.f32 -1.442695, %v585_v49 }
 0x172   :  { %v1584_v34 = vpop.eup %1583  ;;  %1603 = vtanh.f32 %v653_v52  ;;  %v842_v9 = vadd.f32 1.0, %v1582_v4  ;;  %v1278_v52 = vmul.f32 -1.442695, %v581_v30 }
 0x173   :  { %v1586_v10 = vpop.eup %1585  ;;  %1605 = vpow2.f32 %v1275_v63  ;;  %v954_v28 = vmul.f32 %v1584_v34, %v1578_v60  ;;  %v669_v63 = vadd.f32 %v2079_v16, %v1908_v11 }
 0x174   :  { %v1588_v62 = vpop.eup %1587  ;;  %1607 = vrcp.f32 %v842_v9  ;;  %v862_v53 = vadd.f32 1.0, %v1586_v10  ;;  %v573_v10 = vadd.f32 %v2089_v25, %v1908_v11 }
 0x175   :  { %v1590_v35 = vpop.eup %1589  ;;  %1609 = vpow2.f32 %v1295_v54  ;;  %v999_v21 = vmul.f32 %v1960_v39, %v954_v28  ;;  %1086 = vadd.xlane.f32.xlu0 %v1018_v15  ;;  %v974_v33 = vmul.f32 %v1588_v62, %v1580_v14 }
 0x176   :  { %v1592_v22 = vpop.eup %1591  ;;  %1611 = vrcp.f32 %v862_v53  ;;  %v673_v53 = vadd.f32 %v2091_v1, %v1908_v11 }
 0x177   :  { %v1594_v26 = vpop.eup %1593  ;;  %1613 = vtanh.f32 %v559_v6  ;;  %1048 = vadd.xlane.f32.xlu1 %v999_v21  ;;  %v1019_v0 = vmul.f32 %v1960_v39, %v974_v33 }
 0x178   :  { %v1596_v24 = vpop.eup %1595  ;;  %1615 = vtanh.f32 %v659_v18  ;;  %v843_v29 = vadd.f32 1.0, %v1594_v26  ;;  %v579_v26 = vadd.f32 %v2107_v55, %v1908_v11 }
 0x179   :  { %v1598_v37 = vpop.eup %1597  ;;  %1617 = vpow2.f32 %v1276_v20  ;;  %v955_v40 = vmul.f32 %v1596_v24, %v1590_v35 }
 0x17a   :  { %v1600_v41 = vpop.eup %1599  ;;  %1619 = vrcp.f32 %v843_v29  ;;  %v863_v58 = vadd.f32 1.0, %v1598_v37  ;;  %v583_v37 = vadd.f32 %v2116_v7, %v1908_v11 }
 0x17b   :  { %v1602_v31 = vpop.eup %1601  ;;  %1621 = vpow2.f32 %v1296_v19  ;;  %1088 = vadd.xlane.f32.xlu1 %v1019_v0  ;;  %v1000_v43 = vmul.f32 %v1960_v39, %v955_v40  ;;  %v975_v42 = vmul.f32 %v1600_v41, %v1592_v22 }
 0x17c   :  { %v1604_v45 = vpop.eup %1603  ;;  %1623 = vrcp.f32 %v863_v58 }
 0x17d   :  { %v1606_v3 = vpop.eup %1605  ;;  %1625 = vtanh.f32 %v563_v36  ;;  %1050 = vadd.xlane.f32.xlu0 %v1000_v43  ;;  %v1020_v17 = vmul.f32 %v1960_v39, %v975_v42 }
 0x17e   :  { %v1608_v59 = vpop.eup %1607  ;;  %1627 = vtanh.f32 %v663_v32  ;;  %v844_v47 = vadd.f32 1.0, %v1606_v3 }
 0x17f   :  { %v1610_v51 = vpop.eup %1609  ;;  %1629 = vpow2.f32 %v1277_v44  ;;  %v956_v23 = vmul.f32 %v1608_v59, %v1602_v31 }
 0x180   :  { %v1612_v56 = vpop.eup %1611  ;;  %1631 = vrcp.f32 %v844_v47  ;;  %v864_v61 = vadd.f32 1.0, %v1610_v51 }
 0x181   :  { %v1614_v60 = vpop.eup %1613  ;;  %1633 = vpow2.f32 %v1297_v46  ;;  %v1001_v5 = vmul.f32 %v1960_v39, %v956_v23  ;;  %1090 = vadd.xlane.f32.xlu0 %v1020_v17  ;;  %v976_v13 = vmul.f32 %v1612_v56, %v1604_v45 }
 0x182   :  { %v1616_v38 = vpop.eup %1615  ;;  %1635 = vrcp.f32 %v864_v61  ;;  %v2190_v61 = vld [vmem:[#allocation2] ss:$0 sm:$0xff] }
 0x183   :  { %v1618_v14 = vpop.eup %1617  ;;  %1637 = vtanh.f32 %v569_v50  ;;  %1052 = vadd.xlane.f32.xlu1 %v1001_v5  ;;  %v1021_v27 = vmul.f32 %v1960_v39, %v976_v13 }
 0x184   :  { %v1620_v57 = vpop.eup %1619  ;;  %v845_v4 = vadd.f32 1.0, %v1618_v14  ;;  %1639 = vpow2.f32 %v1278_v52 }
 0x185   :  { %v1622_v54 = vpop.eup %1621  ;;  %1641 = vtanh.f32 %v669_v63  ;;  %v957_v34 = vmul.f32 %v1620_v57, %v1614_v60 }
 0x186   :  { %v1624_v16 = vpop.eup %1623  ;;  %1643 = vrcp.f32 %v845_v4  ;;  %v865_v9 = vadd.f32 1.0, %v1622_v54 }
 0x187   :  { %v1626_v6 = vpop.eup %1625  ;;  %1645 = vpow2.f32 %v1279_v12  ;;  %1092 = vadd.xlane.f32.xlu1 %v1021_v27  ;;  %v1002_v8 = vmul.f32 %v1960_v39, %v957_v34  ;;  %v977_v28 = vmul.f32 %v1624_v16, %v1616_v38 }
 0x188   :  { %v1628_v15 = vpop.eup %1627  ;;  %1647 = vrcp.f32 %v865_v9 }
 0x189   :  { %v1630_v62 = vpop.eup %1629  ;;  %1054 = vadd.xlane.f32.xlu0 %v1002_v8  ;;  %1649 = vtanh.f32 %v573_v10  ;;  %v1022_v33 = vmul.f32 %v1960_v39, %v977_v28 }
 0x18a   :  { %v1632_v18 = vpop.eup %1631  ;;  %v846_v35 = vadd.f32 1.0, %v1630_v62 }
 0x18b   :  { %v1634_v20 = vpop.eup %1633  ;;  %v958_v21 = vmul.f32 %v1632_v18, %v1626_v6 }
 0x18c   :  { %v1636_v25 = vpop.eup %1635  ;;  %1651 = vrcp.f32 %v846_v35  ;;  %v866_v22 = vadd.f32 1.0, %v1634_v20 }
 0x18d   :  { %v1638_v19 = vpop.eup %1637  ;;  %1653 = vtanh.f32 %v673_v53  ;;  %v1003_v2 = vmul.f32 %v1960_v39, %v958_v21  ;;  %1094 = vadd.xlane.f32.xlu0 %v1022_v33  ;;  %v978_v1 = vmul.f32 %v1636_v25, %v1628_v15 }
 0x18e   :  { %v1640_v24 = vpop.eup %1639  ;;  %1655 = vrcp.f32 %v866_v22 }
 0x18f   :  { %v1642_v29 = vpop.eup %1641  ;;  %v847_v36 = vadd.f32 1.0, %v1640_v24  ;;  %1056 = vadd.xlane.f32.xlu1 %v1003_v2  ;;  %1657 = vtanh.f32 %v579_v26  ;;  %v1023_v55 = vmul.f32 %v1960_v39, %v978_v1 }
 0x190   :  { %v1644_v48 = vpop.eup %1643 }
 0x191   :  { %v1646_v0 = vpop.eup %1645  ;;  %1659 = vrcp.f32 %v847_v36  ;;  %v959_v40 = vmul.f32 %v1644_v48, %v1638_v19 }
 0x192   :  { %v1648_v41 = vpop.eup %1647  ;;  %v848_v58 = vadd.f32 1.0, %v1646_v0  ;;  %1661 = vtanh.f32 %v583_v37 }
 0x193   :  { %1096 = vadd.xlane.f32.xlu1 %v1023_v55  ;;  %v1004_v32 = vmul.f32 %v1960_v39, %v959_v40  ;;  %v979_v31 = vmul.f32 %v1648_v41, %v1642_v29  ;;  %v1650_v44 = vpop.eup %1649 }
 0x194   :  { %1663 = vrcp.f32 %v848_v58 }
 0x195   :  { %1058 = vadd.xlane.f32.xlu0 %v1004_v32  ;;  %v1024_v17 = vmul.f32 %v1960_v39, %v979_v31 }
 0x196   :  { %v1652_v43 = vpop.eup %1651 }
 0x197   :  { %v1654_v11 = vpop.eup %1653  ;;  %v960_v7 = vmul.f32 %v1652_v43, %v1650_v44 }
 0x198   :  { %v1656_v42 = vpop.eup %1655 }
 0x199   :  { %v1005_v45 = vmul.f32 %v1960_v39, %v960_v7  ;;  %v980_v30 = vmul.f32 %v1656_v42, %v1654_v11  ;;  %v1658_v3 = vpop.eup %1657 }
 0x19b   :  { %v1660_v46 = vpop.eup %1659  ;;  %1060 = vadd.xlane.f32.xlu1 %v1005_v45  ;;  %v1025_v56 = vmul.f32 %v1960_v39, %v980_v30 }
 0x19c   :  { %v961_v59 = vmul.f32 %v1660_v46, %v1658_v3  ;;  %v1662_v47 = vpop.eup %1661 }
 0x19e   :  { %v1664_v50 = vpop.eup %1663  ;;  %v1006_v51 = vmul.f32 %v1960_v39, %v961_v59 }
 0x19f   :  { %v962_v49 = vmul.f32 %v1664_v50, %v1662_v47 }
 0x1a0   :  { %1062 = vadd.xlane.f32.xlu0 %v1006_v51 }
 0x1a1   :  { %v1007_v23 = vmul.f32 %v1960_v39, %v962_v49 }
 0x1a3   :  { %1064 = vadd.xlane.f32.xlu1 %v1007_v23 }
 0x1a4   :  { %1098 = vadd.xlane.f32.xlu0 %v1024_v17 }
 0x1a7   :  { %1100 = vadd.xlane.f32.xlu1 %v1025_v56 }
 0x1c6   :  { %v1027_v52 = vpop.xlane.xlu0 %1026 }
 0x1c7   :  { %v1109_v60 = vadd.f32 %v2190_v61, %v1027_v52 }
 0x1c9   :  { %1148 = vst.msk [vmem:[%s2387_s5] sm:$0xff] %vm1147_vm0, %v1109_v60 }
 0x1ca   :  { %v1067_v63 = vpop.xlane.xlu0 %1066  ;;  %v1069_v13 = vpop.xlane.xlu1 %1068 }
 0x1cb   :  { %v1129_v5 = vadd.f32 %v2190_v61, %v1067_v63  ;;  %v1130_v38 = vadd.f32 %v2190_v61, %v1069_v13 }
 0x1cd   :  { %1168 = vst.msk [vmem:[%s2387_s5 + $0xa0] sm:$0xff] %vm1147_vm0, %v1129_v5  ;;  %1169 = vst.msk [vmem:[%s2387_s5 + $0xa8] sm:$0xff] %vm1147_vm0, %v1130_v38 }
 0x1ce   :  { %v1029_v39 = vpop.xlane.xlu0 %1028 }
 0x1cf   :  { %v1110_v14 = vadd.f32 %v2190_v61, %v1029_v39  ;;  %v1031_v12 = vpop.xlane.xlu1 %1030 }
 0x1d0   :  { %v1111_v57 = vadd.f32 %v2190_v61, %v1031_v12 }
 0x1d1   :  { %1149 = vst.msk [vmem:[%s2387_s5 + $0x8] sm:$0xff] %vm1147_vm0, %v1110_v14 }
 0x1d2   :  { %v1071_v4 = vpop.xlane.xlu0 %1070  ;;  %1150 = vst.msk [vmem:[%s2387_s5 + $0x10] sm:$0xff] %vm1147_vm0, %v1111_v57 }
 0x1d3   :  { %v1131_v54 = vadd.f32 %v2190_v61, %v1071_v4  ;;  %v1033_v27 = vpop.xlane.xlu1 %1032 }
 0x1d4   :  { %v1112_v34 = vadd.f32 %v2190_v61, %v1033_v27 }
 0x1d5   :  { %1170 = vst.msk [vmem:[%s2387_s5 + $0xb0] sm:$0xff] %vm1147_vm0, %v1131_v54 }
 0x1d6   :  { %1151 = vst.msk [vmem:[%s2387_s5 + $0x18] sm:$0xff] %vm1147_vm0, %v1112_v34 }
 0x1d7   :  { %v1073_v16 = vpop.xlane.xlu1 %1072 }
 0x1d8   :  { %v1132_v9 = vadd.f32 %v2190_v61, %v1073_v16 }
 0x1d9   :  { %v1035_v6 = vpop.xlane.xlu0 %1034 }
 0x1da   :  { %1171 = vst.msk [vmem:[%s2387_s5 + $0xb8] sm:$0xff] %vm1147_vm0, %v1132_v9  ;;  %v1113_v10 = vadd.f32 %v2190_v61, %v1035_v6 }
 0x1dc   :  { %1152 = vst.msk [vmem:[%s2387_s5 + $0x20] sm:$0xff] %vm1147_vm0, %v1113_v10 }
 0x1dd   :  { %v1075_v8 = vpop.xlane.xlu0 %1074 }
 0x1de   :  { %v1133_v28 = vadd.f32 %v2190_v61, %v1075_v8 }
 0x1e0   :  { %1172 = vst.msk [vmem:[%s2387_s5 + $0xc0] sm:$0xff] %vm1147_vm0, %v1133_v28 }
 0x1e2   :  { %v1037_v15 = vpop.xlane.xlu1 %1036 }
 0x1e3   :  { %v1114_v62 = vadd.f32 %v2190_v61, %v1037_v15 }
 0x1e5   :  { %1153 = vst.msk [vmem:[%s2387_s5 + $0x28] sm:$0xff] %vm1147_vm0, %v1114_v62 }
 0x1e6   :  { %v1077_v53 = vpop.xlane.xlu1 %1076  ;;  %v1039_v18 = vpop.xlane.xlu0 %1038 }
 0x1e7   :  { %v1134_v35 = vadd.f32 %v2190_v61, %v1077_v53  ;;  %v1115_v20 = vadd.f32 %v2190_v61, %v1039_v18 }
 0x1e9   :  { %1173 = vst.msk [vmem:[%s2387_s5 + $0xc8] sm:$0xff] %vm1147_vm0, %v1134_v35  ;;  %1154 = vst.msk [vmem:[%s2387_s5 + $0x30] sm:$0xff] %vm1147_vm0, %v1115_v20 }
 0x1ea   :  { %v1079_v21 = vpop.xlane.xlu0 %1078 }
 0x1eb   :  { %v1135_v33 = vadd.f32 %v2190_v61, %v1079_v21 }
 0x1ec   :  { %v1041_v25 = vpop.xlane.xlu1 %1040 }
 0x1ed   :  { %v1116_v22 = vadd.f32 %v2190_v61, %v1041_v25  ;;  %1174 = vst.msk [vmem:[%s2387_s5 + $0xd0] sm:$0xff] %vm1147_vm0, %v1135_v33 }
 0x1ef   :  { %1155 = vst.msk [vmem:[%s2387_s5 + $0x38] sm:$0xff] %vm1147_vm0, %v1116_v22 }
 0x1f0   :  { %v1081_v26 = vpop.xlane.xlu1 %1080 }
 0x1f1   :  { %v1136_v19 = vadd.f32 %v2190_v61, %v1081_v26 }
 0x1f2   :  { %v1043_v2 = vpop.xlane.xlu0 %1042 }
 0x1f3   :  { %1175 = vst.msk [vmem:[%s2387_s5 + $0xd8] sm:$0xff] %vm1147_vm0, %v1136_v19  ;;  %v1117_v1 = vadd.f32 %v2190_v61, %v1043_v2 }
 0x1f5   :  { %1156 = vst.msk [vmem:[%s2387_s5 + $0x40] sm:$0xff] %vm1147_vm0, %v1117_v1 }
 0x1f6   :  { %v1083_v24 = vpop.xlane.xlu0 %1082 }
 0x1f7   :  { %v1137_v29 = vadd.f32 %v2190_v61, %v1083_v24 }
 0x1f8   :  { %v1045_v36 = vpop.xlane.xlu1 %1044 }
 0x1f9   :  { %v1118_v37 = vadd.f32 %v2190_v61, %v1045_v36  ;;  %1176 = vst.msk [vmem:[%s2387_s5 + $0xe0] sm:$0xff] %vm1147_vm0, %v1137_v29 }
 0x1fb   :  { %1157 = vst.msk [vmem:[%s2387_s5 + $0x48] sm:$0xff] %vm1147_vm0, %v1118_v37 }
 0x1fc   :  { %v1085_v48 = vpop.xlane.xlu1 %1084 }
 0x1fd   :  { %v1138_v0 = vadd.f32 %v2190_v61, %v1085_v48 }
 0x1fe   :  { %v1047_v55 = vpop.xlane.xlu0 %1046 }
 0x1ff   :  { %1177 = vst.msk [vmem:[%s2387_s5 + $0xe8] sm:$0xff] %vm1147_vm0, %v1138_v0  ;;  %v1119_v40 = vadd.f32 %v2190_v61, %v1047_v55 }
 0x201   :  { %1158 = vst.msk [vmem:[%s2387_s5 + $0x50] sm:$0xff] %vm1147_vm0, %v1119_v40 }
 0x202   :  { %v1087_v41 = vpop.xlane.xlu0 %1086 }
 0x203   :  { %v1139_v58 = vadd.f32 %v2190_v61, %v1087_v41 }
 0x204   :  { %v1049_v32 = vpop.xlane.xlu1 %1048 }
 0x205   :  { %v1120_v31 = vadd.f32 %v2190_v61, %v1049_v32  ;;  %1178 = vst.msk [vmem:[%s2387_s5 + $0xf0] sm:$0xff] %vm1147_vm0, %v1139_v58 }
 0x207   :  { %1159 = vst.msk [vmem:[%s2387_s5 + $0x58] sm:$0xff] %vm1147_vm0, %v1120_v31 }
 0x208   :  { %v1089_v44 = vpop.xlane.xlu1 %1088 }
 0x209   :  { %v1140_v43 = vadd.f32 %v2190_v61, %v1089_v44 }
 0x20a   :  { %v1051_v11 = vpop.xlane.xlu0 %1050 }
 0x20b   :  { %1179 = vst.msk [vmem:[%s2387_s5 + $0xf8] sm:$0xff] %vm1147_vm0, %v1140_v43  ;;  %v1121_v7 = vadd.f32 %v2190_v61, %v1051_v11 }
 0x20d   :  { %1160 = vst.msk [vmem:[%s2387_s5 + $0x60] sm:$0xff] %vm1147_vm0, %v1121_v7 }
 0x20e   :  { %v1091_v42 = vpop.xlane.xlu0 %1090 }
 0x20f   :  { %v1141_v45 = vadd.f32 %v2190_v61, %v1091_v42 }
 0x210   :  { %v1053_v30 = vpop.xlane.xlu1 %1052 }
 0x211   :  { %v1122_v3 = vadd.f32 %v2190_v61, %v1053_v30  ;;  %1180 = vst.msk [vmem:[%s2387_s5 + $0x100] sm:$0xff] %vm1147_vm0, %v1141_v45 }
 0x213   :  { %1161 = vst.msk [vmem:[%s2387_s5 + $0x68] sm:$0xff] %vm1147_vm0, %v1122_v3 }
 0x214   :  { %v1093_v46 = vpop.xlane.xlu1 %1092 }
 0x215   :  { %v1142_v59 = vadd.f32 %v2190_v61, %v1093_v46 }
 0x216   :  { %v1055_v47 = vpop.xlane.xlu0 %1054 }
 0x217   :  { %1181 = vst.msk [vmem:[%s2387_s5 + $0x108] sm:$0xff] %vm1147_vm0, %v1142_v59  ;;  %v1123_v50 = vadd.f32 %v2190_v61, %v1055_v47 }
 0x219   :  { %1162 = vst.msk [vmem:[%s2387_s5 + $0x70] sm:$0xff] %vm1147_vm0, %v1123_v50 }
 0x21a   :  { %v1095_v51 = vpop.xlane.xlu0 %1094 }
 0x21b   :  { %v1143_v49 = vadd.f32 %v2190_v61, %v1095_v51 }
 0x21c   :  { %v1057_v23 = vpop.xlane.xlu1 %1056 }
 0x21d   :  { %v1124_v17 = vadd.f32 %v2190_v61, %v1057_v23  ;;  %1182 = vst.msk [vmem:[%s2387_s5 + $0x110] sm:$0xff] %vm1147_vm0, %v1143_v49 }
 0x21f   :  { %1163 = vst.msk [vmem:[%s2387_s5 + $0x78] sm:$0xff] %vm1147_vm0, %v1124_v17 }
 0x220   :  { %v1097_v56 = vpop.xlane.xlu1 %1096 }
 0x221   :  { %v1144_v52 = vadd.f32 %v2190_v61, %v1097_v56 }
 0x222   :  { %v1059_v60 = vpop.xlane.xlu0 %1058 }
 0x223   :  { %1183 = vst.msk [vmem:[%s2387_s5 + $0x118] sm:$0xff] %vm1147_vm0, %v1144_v52  ;;  %v1125_v63 = vadd.f32 %v2190_v61, %v1059_v60 }
 0x225   :  { %1164 = vst.msk [vmem:[%s2387_s5 + $0x80] sm:$0xff] %vm1147_vm0, %v1125_v63 }
 0x228   :  { %v1061_v5 = vpop.xlane.xlu1 %1060 }
 0x229   :  { %v1126_v13 = vadd.f32 %v2190_v61, %v1061_v5 }
 0x22b   :  { %1165 = vst.msk [vmem:[%s2387_s5 + $0x88] sm:$0xff] %vm1147_vm0, %v1126_v13 }
 0x22d   :  { %v1063_v38 = vpop.xlane.xlu0 %1062 }
 0x22e   :  { %v1127_v39 = vadd.f32 %v2190_v61, %v1063_v38 }
 0x230   :  { %1166 = vst.msk [vmem:[%s2387_s5 + $0x90] sm:$0xff] %vm1147_vm0, %v1127_v39  ;;  %v1065_v14 = vpop.xlane.xlu1 %1064 }
 0x231   :  { %v1128_v12 = vadd.f32 %v2190_v61, %v1065_v14  ;;  %v1099_v57 = vpop.xlane.xlu0 %1098 }
 0x232   :  { %v1145_v4 = vadd.f32 %v2190_v61, %v1099_v57 }
 0x233   :  { %1167 = vst.msk [vmem:[%s2387_s5 + $0x98] sm:$0xff] %vm1147_vm0, %v1128_v12 }
 0x234   :  { %1184 = vst.msk [vmem:[%s2387_s5 + $0x120] sm:$0xff] %vm1147_vm0, %v1145_v4  ;;  %v1101_v54 = vpop.xlane.xlu1 %1100 }
 0x235   :  { %v1146_v27 = vadd.f32 %v2190_v61, %v1101_v54 }
 0x237   :  { %1185 = vst.msk [vmem:[%s2387_s5 + $0x128] sm:$0xff] %vm1147_vm0, %v1146_v27 }

</bundles_post_ra>
